<compile_context>
chip_gen: v7x
topology: tpu7x:2x2x1
jax: 0.10.0
libtpu: 0.0.40
codegen_flags: <defaults>
</compile_context>

<pallas_src>
import math
import functools

import jax
import jax.numpy as jnp
from jax import lax
from jax.experimental import pallas as pl
from jax.experimental.pallas import tpu as pltpu


def _round_up(x, m):
    return (x + m - 1) // m * m


def _lm_head_kernel(x_ref, w1_ref, b1_ref, g_ref, beta_ref, w2_ref, b2_ref,
                    o_ref, hn_ref, *, ln_eps, matmul_dtype, approximate_gelu):
    # Dense -> GELU -> LayerNorm computed once per token tile (first vocab
    # step) and cached in VMEM scratch for all remaining vocab tiles.
    @pl.when(pl.program_id(1) == 0)
    def _():
        # MXU matmul in the (narrow) matmul dtype, f32 accumulation.
        h = jnp.dot(x_ref[...].astype(matmul_dtype),
                    w1_ref[...].astype(matmul_dtype),
                    preferred_element_type=jnp.float32)
        h = h + b1_ref[...].astype(jnp.float32)

        if approximate_gelu:
            # tanh approximation runs on the EUP slot (opt-in, not exact).
            h = jax.nn.gelu(h, approximate=True)
        else:
            # Exact GELU (erf form), matching transformers' `gelu`.
            h = 0.5 * h * (1.0 + lax.erf(h * (1.0 / math.sqrt(2.0))))

        # LayerNorm over the hidden dim; statistics kept in f32 (padded
        # zero-rows give rsqrt(eps) which is large-but-finite and discarded).
        mu = jnp.mean(h, axis=-1, keepdims=True)
        var = jnp.mean((h - mu) ** 2, axis=-1, keepdims=True)
        hn = (h - mu) * lax.rsqrt(var + ln_eps)
        hn = hn * g_ref[...].astype(jnp.float32) + beta_ref[...].astype(jnp.float32)

        hn_ref[...] = hn.astype(hn_ref.dtype)

    # Decoder: (tm, H) @ (H, tv) on the MXU, f32 accumulation, bias add.
    out = jnp.dot(hn_ref[...], w2_ref[...].astype(hn_ref.dtype),
                  preferred_element_type=jnp.float32)
    out = out + b2_ref[...].astype(jnp.float32)
    o_ref[...] = out.astype(o_ref.dtype)


def _vmem_budget_bytes():
    """Per-generation VMEM budget (leave headroom for compiler scratch)."""
    try:
        cap = int(pltpu.get_tpu_info().vmem_capacity_bytes)
    except Exception:
        cap = 64 * 1024 * 1024  # safe on every generation
    return int(cap * 0.85)      # ~54 MiB on v7x, ~108 MiB on v5e/v6e


def _auto_min_token_tiles():
    """>=2 token tiles on v7x so both TensorCores get work ('parallel' axis)."""
    try:
        kind = jax.devices()[0].device_kind.lower()
        return 2 if "v7" in kind else 1
    except Exception:
        return 1


def long_skimformer_lm_head(features, params, *, ln_eps=1e-5, tm=1024, tv=512,
                            matmul_dtype=None, out_dtype=None,
                            approximate_gelu=False, min_token_tiles=None):
    """features: [B, S, H] -> logits [B, S, V].

    For the full memory-bandwidth benefit, store `dense_w` / `decoder_w` in
    bf16; otherwise the kernel still casts MXU operands to `matmul_dtype`
    (default bf16 when inputs are f32) and pre-casts the re-streamed decoder
    weight when profitable.
    """
    B, S, H = features.shape
    w1 = params["dense_w"]          # (H, H)
    b1 = params["dense_b"]          # (H,)
    gamma = params["ln_gamma"]      # (H,)
    beta = params["ln_beta"]        # (H,)
    w2 = params["decoder_w"]        # (H, V)
    b2 = params["decoder_b"]        # (V,)
    V = w2.shape[1]
    M = B * S

    if matmul_dtype is None:
        # Feed the MXU bf16 unless the caller already uses a narrow dtype.
        wide = any(jnp.dtype(d) == jnp.float32
                   for d in (features.dtype, w1.dtype, w2.dtype))
        matmul_dtype = jnp.bfloat16 if wide else features.dtype
    if out_dtype is None:
        out_dtype = features.dtype
    if min_token_tiles is None:
        min_token_tiles = _auto_min_token_tiles()

    x_isz = jnp.dtype(features.dtype).itemsize
    w1_isz = jnp.dtype(w1.dtype).itemsize
    w2_isz = jnp.dtype(w2.dtype).itemsize
    mm_isz = jnp.dtype(matmul_dtype).itemsize
    o_isz = jnp.dtype(out_dtype).itemsize

    # ---- Tile selection --------------------------------------------------
    # tm multiple of 16 (covers bf16 sublane packing), tv multiple of 128
    # (lane-dense output). Clamp to the (padded) problem size.
    tm_eff = min(tm, _round_up(M, 16))
    tv_eff = min(tv, _round_up(V, 128))

    vmem_budget = _vmem_budget_bytes()

    def _need(tm_e, tv_e):
        # Conservative: assumes double-buffered W1 even though we request
        # single-buffering for it below.
        return (2 * tm_e * H * x_isz              # x tiles
                + 2 * H * H * w1_isz              # dense W
                + 2 * H * tv_e * w2_isz           # decoder W tile
                + 2 * tm_e * tv_e * o_isz         # output tile
                + tm_e * H * mm_isz               # hn scratch
                + 2 * 8 * (3 * H + tv_e) * 4)     # biases / gamma / beta

    # Shrink tv first (does not change total W2 HBM traffic), then tm.
    while _need(tm_eff, tv_eff) > vmem_budget:
        if tv_eff > 256:
            tv_eff = _round_up(tv_eff // 2, 128)
        elif tm_eff > 256:
            tm_eff = _round_up(tm_eff // 2, 16)
        elif tv_eff > 128:
            tv_eff = 128
        elif tm_eff > 16:
            tm_eff = _round_up(tm_eff // 2, 16)
        else:
            break

    # On v7x make sure there are >= 2 token tiles so both TCs are busy.
    M_pad = _round_up(M, tm_eff)
    while (M_pad // tm_eff) < min_token_tiles and tm_eff > 16:
        tm_eff = _round_up(max(16, tm_eff // 2), 16)
        M_pad = _round_up(M, tm_eff)
    V_pad = _round_up(V, tv_eff)
    grid_m = M_pad // tm_eff
    grid_v = V_pad // tv_eff

    # ---- Padding (only when needed) --------------------------------------
    x2d = features.reshape(M, H)
    if M_pad != M:
        x2d = jnp.pad(x2d, ((0, M_pad - M), (0, 0)))
    w2_p, b2_p = w2, b2
    if V_pad != V:
        w2_p = jnp.pad(w2, ((0, 0), (0, V_pad - V)))
        b2_p = jnp.pad(b2, ((0, V_pad - V),))

    # Pre-cast the decoder weight once when it is re-streamed many times so
    # the dominant HBM stream is in the narrow matmul dtype (under jit with
    # constant weights XLA folds/hoists this cast).
    w2_stream = w2_p
    if (grid_m >= 4
            and jnp.dtype(w2_p.dtype).itemsize > jnp.dtype(matmul_dtype).itemsize):
        w2_stream = w2_p.astype(matmul_dtype)
    w2s_isz = jnp.dtype(w2_stream.dtype).itemsize

    b1_2d = b1.reshape(1, H)
    g_2d = gamma.reshape(1, H)
    beta_2d = beta.reshape(1, H)
    b2_2d = b2_p.reshape(1, V_pad)

    # ---- Cost estimate (includes decoder-W re-streaming) ------------------
    cost = pl.CostEstimate(
        flops=2 * M_pad * H * H + 2 * M_pad * H * V_pad,
        transcendentals=M_pad * H,
        bytes_accessed=(M_pad * H * x_isz                        # x
                        + H * H * w1_isz                         # dense W (once)
                        + grid_m * (H * V_pad * w2s_isz          # decoder W re-streamed
                                    + V_pad * 4)                 # decoder bias
                        + M_pad * V_pad * o_isz                  # logits
                        + 3 * H * 4),
    )

    kernel = functools.partial(_lm_head_kernel, ln_eps=float(ln_eps),
                               matmul_dtype=matmul_dtype,
                               approximate_gelu=approximate_gelu)
    vmem_limit = int(vmem_budget)

    def _build_and_call(single_buffer_consts):
        if single_buffer_consts:
            # Constant-index blocks (index_map always (0,0)): single-buffer
            # them so the resident HxH dense weight is not duplicated.
            def const_spec(shape):
                return pl.BlockSpec(shape, lambda i, j: (0, 0),
                                    pipeline_mode=pl.Buffered(1))
        else:
            def const_spec(shape):
                return pl.BlockSpec(shape, lambda i, j: (0, 0))

        grid_spec = pltpu.PrefetchScalarGridSpec(
            num_scalar_prefetch=0,
            # Vocab axis innermost ("arbitrary") so the cached hn is valid
            # across it; token axis outermost ("parallel") for megacore.
            grid=(grid_m, grid_v),
            in_specs=[
                pl.BlockSpec((tm_eff, H), lambda i, j: (i, 0)),     # x tile
                const_spec((H, H)),                                 # dense W
                const_spec((1, H)),                                 # dense b
                const_spec((1, H)),                                 # ln gamma
                const_spec((1, H)),                                 # ln beta
                pl.BlockSpec((H, tv_eff), lambda i, j: (0, j)),     # decoder W tile
                pl.BlockSpec((1, tv_eff), lambda i, j: (0, j)),     # decoder b tile
            ],
            out_specs=pl.BlockSpec((tm_eff, tv_eff), lambda i, j: (i, j)),
            scratch_shapes=[pltpu.VMEM((tm_eff, H), matmul_dtype)],  # cached hn
        )
        return pl.pallas_call(
            kernel,
            out_shape=jax.ShapeDtypeStruct((M_pad, V_pad), out_dtype),
            grid_spec=grid_spec,
            compiler_params=pltpu.CompilerParams(
                dimension_semantics=("parallel", "arbitrary"),
                vmem_limit_bytes=vmem_limit),
            cost_estimate=cost,
        )(x2d, w1, b1_2d, g_2d, beta_2d, w2_stream, b2_2d)

    if hasattr(pl, "Buffered"):
        try:
            out = _build_and_call(True)
        except Exception:
            # Fallback for jax versions where pipeline_mode / Buffered(1) is
            # not supported on this path.
            out = _build_and_call(False)
    else:
        out = _build_and_call(False)

    if M_pad == M and V_pad == V:
        return out.reshape(B, S, V)
    return out[:M, :V].reshape(B, S, V)


def _reference(features, params, ln_eps=1e-5):
    x = features.astype(jnp.float32)
    h = x @ params["dense_w"].astype(jnp.float32) + params["dense_b"]
    h = 0.5 * h * (1.0 + lax.erf(h / jnp.sqrt(2.0)))
    mu = jnp.mean(h, axis=-1, keepdims=True)
    var = jnp.mean((h - mu) ** 2, axis=-1, keepdims=True)
    hn = (h - mu) * lax.rsqrt(var + ln_eps)
    hn = hn * params["ln_gamma"] + params["ln_beta"]
    return hn @ params["decoder_w"].astype(jnp.float32) + params["decoder_b"]


if __name__ == "__main__":
    # Small config consistent with the module: hidden_size=128, vocab_size=256.
    B, S, H, V = 2, 8, 128, 256
    ln_eps = 1e-5

    key = jax.random.PRNGKey(0)
    k_feat, k_w1, k_b1, k_w2 = jax.random.split(key, 4)

    features = jax.random.normal(k_feat, (B, S, H), dtype=jnp.float32)

    # Deterministic synthetic parameters (shapes follow nn.Linear / LayerNorm).
    params = {
        "dense_w": jax.random.normal(k_w1, (H, H), dtype=jnp.float32) * 0.02,
        "dense_b": jax.random.normal(k_b1, (H,), dtype=jnp.float32) * 0.02,
        "ln_gamma": jnp.ones((H,), dtype=jnp.float32),
        "ln_beta": jnp.zeros((H,), dtype=jnp.float32),
        "decoder_w": jax.random.normal(k_w2, (H, V), dtype=jnp.float32) * 0.02,
        "decoder_b": jnp.zeros((V,), dtype=jnp.float32),  # self.bias init = zeros
    }

    ref = _reference(features, params, ln_eps=ln_eps)

    # Exact-precision path (f32 MXU operands): tight check of the fused math.
    logits_f32 = long_skimformer_lm_head(features, params, ln_eps=ln_eps,
                                         matmul_dtype=jnp.float32)
    logits_f32 = jax.block_until_ready(logits_f32)
    assert logits_f32.shape == (B, S, V)
    assert jnp.allclose(logits_f32, ref, rtol=1e-5, atol=1e-5), \
        "mismatch vs reference (f32 path)"

    # Default fast path (bf16 MXU operands, f32 accumulation): loose check.
    logits = long_skimformer_lm_head(features, params, ln_eps=ln_eps)
    logits = jax.block_until_ready(logits)
    assert logits.shape == (B, S, V)
    assert jnp.allclose(logits.astype(jnp.float32), ref, rtol=2e-2, atol=2e-2), \
        "mismatch vs reference (bf16 path)"

    print("KERNEL_OK")
</pallas_src>

<mosaic_0001>
module attributes {stable_mosaic.version = 11 : i64} {
  func.func @_lm_head_kernel(%arg0: i32, %arg1: i32, %arg2: memref<16x128xf32, #tpu.memory_space<vmem>>, %arg3: memref<128x128xf32, #tpu.memory_space<vmem>>, %arg4: memref<1x128xf32, #tpu.memory_space<vmem>>, %arg5: memref<1x128xf32, #tpu.memory_space<vmem>>, %arg6: memref<1x128xf32, #tpu.memory_space<vmem>>, %arg7: memref<128x256xf32, #tpu.memory_space<vmem>>, %arg8: memref<1x256xf32, #tpu.memory_space<vmem>>, %arg9: memref<16x256xf32, #tpu.memory_space<vmem>>, %arg10: memref<16x128xf32, #tpu.memory_space<vmem>>) attributes {dimension_semantics = [#tpu.dimension_semantics<parallel>, #tpu.dimension_semantics<arbitrary>], iteration_bounds = array<i64: 1, 1>, scalar_prefetch = 0 : i64, scratch_operands = 1 : i64, tpu.core_type = #tpu.core_type<tc>, window_params = [{transform_indices = @transform_0, window_bounds = array<i64: 16, 128>}, {pipeline_mode = #tpu.pipeline_mode<synchronous>, transform_indices = @transform_1, window_bounds = array<i64: 128, 128>}, {pipeline_mode = #tpu.pipeline_mode<synchronous>, transform_indices = @transform_2, window_bounds = array<i64: 1, 128>}, {pipeline_mode = #tpu.pipeline_mode<synchronous>, transform_indices = @transform_3, window_bounds = array<i64: 1, 128>}, {pipeline_mode = #tpu.pipeline_mode<synchronous>, transform_indices = @transform_4, window_bounds = array<i64: 1, 128>}, {transform_indices = @transform_5, window_bounds = array<i64: 128, 256>}, {transform_indices = @transform_6, window_bounds = array<i64: 1, 256>}, {transform_indices = @transform_7, window_bounds = array<i64: 16, 256>}]} {
    %c0_i32 = arith.constant 0 : i32
    %0 = arith.cmpi eq, %arg1, %c0_i32 : i32
    %1 = arith.extui %0 : i1 to i32
    %c0_i32_0 = arith.constant 0 : i32
    %2 = arith.cmpi ne, %1, %c0_i32_0 : i32
    scf.if %2 {
      %c0_8 = arith.constant 0 : index
      %c0_9 = arith.constant 0 : index
      %10 = vector.load %arg2[%c0_8, %c0_9] : memref<16x128xf32, #tpu.memory_space<vmem>>, vector<16x128xf32>
      %c0_10 = arith.constant 0 : index
      %c0_11 = arith.constant 0 : index
      %11 = vector.load %arg3[%c0_10, %c0_11] : memref<128x128xf32, #tpu.memory_space<vmem>>, vector<128x128xf32>
      %cst_12 = arith.constant dense<0.000000e+00> : vector<16x128xf32>
      %12 = tpu.matmul %10, %11, %cst_12 {dimension_numbers = #tpu.dot_dimension_numbers<[1], [0], [0], [1], [0, 0, 1, 1], [], []>} : vector<16x128xf32>, vector<128x128xf32>, vector<16x128xf32> -> vector<16x128xf32>
      %c0_13 = arith.constant 0 : index
      %c0_14 = arith.constant 0 : index
      %13 = vector.load %arg4[%c0_13, %c0_14] : memref<1x128xf32, #tpu.memory_space<vmem>>, vector<1x128xf32>
      %14 = vector.broadcast %13 : vector<1x128xf32> to vector<16x128xf32>
      %15 = arith.addf %12, %14 : vector<16x128xf32>
      %cst_15 = arith.constant 5.000000e-01 : f32
      %16 = vector.broadcast %cst_15 : f32 to vector<16x128xf32>
      %17 = arith.mulf %16, %15 : vector<16x128xf32>
      %cst_16 = arith.constant 0.707106769 : f32
      %18 = vector.broadcast %cst_16 : f32 to vector<16x128xf32>
      %19 = arith.mulf %15, %18 : vector<16x128xf32>
      %20 = math.erf %19 : vector<16x128xf32>
      %cst_17 = arith.constant 1.000000e+00 : f32
      %21 = vector.broadcast %cst_17 : f32 to vector<16x128xf32>
      %22 = arith.addf %21, %20 : vector<16x128xf32>
      %23 = arith.mulf %17, %22 : vector<16x128xf32>
      %cst_18 = arith.constant dense<0.000000e+00> : vector<16xf32>
      %24 = vector.multi_reduction <add>, %23, %cst_18 [1] : vector<16x128xf32> to vector<16xf32>
      %25 = vector.shape_cast %24 : vector<16xf32> to vector<16x1xf32>
      %cst_19 = arith.constant 1.280000e+02 : f32
      %26 = vector.broadcast %cst_19 : f32 to vector<16x1xf32>
      %27 = arith.divf %25, %26 : vector<16x1xf32>
      %28 = vector.broadcast %27 : vector<16x1xf32> to vector<16x128xf32>
      %29 = arith.subf %23, %28 : vector<16x128xf32>
      %30 = arith.mulf %29, %29 : vector<16x128xf32>
      %cst_20 = arith.constant dense<0.000000e+00> : vector<16xf32>
      %31 = vector.multi_reduction <add>, %30, %cst_20 [1] : vector<16x128xf32> to vector<16xf32>
      %32 = vector.shape_cast %31 : vector<16xf32> to vector<16x1xf32>
      %cst_21 = arith.constant 1.280000e+02 : f32
      %33 = vector.broadcast %cst_21 : f32 to vector<16x1xf32>
      %34 = arith.divf %32, %33 : vector<16x1xf32>
      %35 = vector.broadcast %27 : vector<16x1xf32> to vector<16x128xf32>
      %36 = arith.subf %23, %35 : vector<16x128xf32>
      %cst_22 = arith.constant 9.99999974E-6 : f32
      %37 = vector.broadcast %cst_22 : f32 to vector<16x1xf32>
      %38 = arith.addf %34, %37 : vector<16x1xf32>
      %39 = math.rsqrt %38 : vector<16x1xf32>
      %40 = vector.broadcast %39 : vector<16x1xf32> to vector<16x128xf32>
      %41 = arith.mulf %36, %40 : vector<16x128xf32>
      %c0_23 = arith.constant 0 : index
      %c0_24 = arith.constant 0 : index
      %42 = vector.load %arg5[%c0_23, %c0_24] : memref<1x128xf32, #tpu.memory_space<vmem>>, vector<1x128xf32>
      %43 = vector.broadcast %42 : vector<1x128xf32> to vector<16x128xf32>
      %44 = arith.mulf %41, %43 : vector<16x128xf32>
      %c0_25 = arith.constant 0 : index
      %c0_26 = arith.constant 0 : index
      %45 = vector.load %arg6[%c0_25, %c0_26] : memref<1x128xf32, #tpu.memory_space<vmem>>, vector<1x128xf32>
      %46 = vector.broadcast %45 : vector<1x128xf32> to vector<16x128xf32>
      %47 = arith.addf %44, %46 : vector<16x128xf32>
      %c0_27 = arith.constant 0 : index
      %c0_28 = arith.constant 0 : index
      %48 = vector.load %arg10[%c0_27, %c0_28] : memref<16x128xf32, #tpu.memory_space<vmem>>, vector<16x128xf32>
      tpu.vector_store %arg10[%c0_27, %c0_28], %47 {strides = array<i32>} : memref<16x128xf32, #tpu.memory_space<vmem>>, vector<16x128xf32>,
    } else {
    }
    %c0 = arith.constant 0 : index
    %c0_1 = arith.constant 0 : index
    %3 = vector.load %arg10[%c0, %c0_1] : memref<16x128xf32, #tpu.memory_space<vmem>>, vector<16x128xf32>
    %c0_2 = arith.constant 0 : index
    %c0_3 = arith.constant 0 : index
    %4 = vector.load %arg7[%c0_2, %c0_3] : memref<128x256xf32, #tpu.memory_space<vmem>>, vector<128x256xf32>
    %cst = arith.constant dense<0.000000e+00> : vector<16x256xf32>
    %5 = tpu.matmul %3, %4, %cst {dimension_numbers = #tpu.dot_dimension_numbers<[1], [0], [0], [1], [0, 0, 1, 1], [], []>} : vector<16x128xf32>, vector<128x256xf32>, vector<16x256xf32> -> vector<16x256xf32>
    %c0_4 = arith.constant 0 : index
    %c0_5 = arith.constant 0 : index
    %6 = vector.load %arg8[%c0_4, %c0_5] : memref<1x256xf32, #tpu.memory_space<vmem>>, vector<1x256xf32>
    %7 = vector.broadcast %6 : vector<1x256xf32> to vector<16x256xf32>
    %8 = arith.addf %5, %7 : vector<16x256xf32>
    %c0_6 = arith.constant 0 : index
    %c0_7 = arith.constant 0 : index
    %9 = vector.load %arg9[%c0_6, %c0_7] : memref<16x256xf32, #tpu.memory_space<vmem>>, vector<16x256xf32>
    tpu.vector_store %arg9[%c0_6, %c0_7], %8 {strides = array<i32>} : memref<16x256xf32, #tpu.memory_space<vmem>>, vector<16x256xf32>,
    return
  }
  func.func @transform_0(%arg0: i32, %arg1: i32) -> (i32, i32) {
    %c0_i32 = arith.constant 0 : i32
    %c0_i32_0 = arith.constant 0 : i32
    return %arg0, %c0_i32 : i32, i32
  }
  func.func @transform_1(%arg0: i32, %arg1: i32) -> (i32, i32) {
    %c0_i32 = arith.constant 0 : i32
    %c0_i32_0 = arith.constant 0 : i32
    %c0_i32_1 = arith.constant 0 : i32
    return %c0_i32, %c0_i32_0 : i32, i32
  }
  func.func @transform_2(%arg0: i32, %arg1: i32) -> (i32, i32) {
    %c0_i32 = arith.constant 0 : i32
    %c0_i32_0 = arith.constant 0 : i32
    %c0_i32_1 = arith.constant 0 : i32
    return %c0_i32, %c0_i32_0 : i32, i32
  }
  func.func @transform_3(%arg0: i32, %arg1: i32) -> (i32, i32) {
    %c0_i32 = arith.constant 0 : i32
    %c0_i32_0 = arith.constant 0 : i32
    %c0_i32_1 = arith.constant 0 : i32
    return %c0_i32, %c0_i32_0 : i32, i32
  }
  func.func @transform_4(%arg0: i32, %arg1: i32) -> (i32, i32) {
    %c0_i32 = arith.constant 0 : i32
    %c0_i32_0 = arith.constant 0 : i32
    %c0_i32_1 = arith.constant 0 : i32
    return %c0_i32, %c0_i32_0 : i32, i32
  }
  func.func @transform_5(%arg0: i32, %arg1: i32) -> (i32, i32) {
    %c0_i32 = arith.constant 0 : i32
    %c0_i32_0 = arith.constant 0 : i32
    return %c0_i32, %arg1 : i32, i32
  }
  func.func @transform_6(%arg0: i32, %arg1: i32) -> (i32, i32) {
    %c0_i32 = arith.constant 0 : i32
    %c0_i32_0 = arith.constant 0 : i32
    return %c0_i32, %arg1 : i32, i32
  }
  func.func @transform_7(%arg0: i32, %arg1: i32) -> (i32, i32) {
    %c0_i32 = arith.constant 0 : i32
    return %arg0, %arg1 : i32, i32
  }
}

module attributes {stable_mosaic.version = 11 : i64} {
  func.func @_lm_head_kernel(%arg0: i32, %arg1: i32, %arg2: memref<16x128xf32, #tpu.memory_space<vmem>>, %arg3: memref<128x128xf32, #tpu.memory_space<vmem>>, %arg4: memref<1x128xf32, #tpu.memory_space<vmem>>, %arg5: memref<1x128xf32, #tpu.memory_space<vmem>>, %arg6: memref<1x128xf32, #tpu.memory_space<vmem>>, %arg7: memref<128x256xf32, #tpu.memory_space<vmem>>, %arg8: memref<1x256xf32, #tpu.memory_space<vmem>>, %arg9: memref<16x256xf32, #tpu.memory_space<vmem>>, %arg10: memref<16x128xf32, #tpu.memory_space<vmem>>) attributes {dimension_semantics = [#tpu.dimension_semantics<parallel>, #tpu.dimension_semantics<arbitrary>], iteration_bounds = array<i64: 1, 1>, scalar_prefetch = 0 : i64, scratch_operands = 1 : i64, tpu.core_type = #tpu.core_type<tc>, window_params = [{transform_indices = @transform_0, window_bounds = array<i64: 16, 128>}, {pipeline_mode = #tpu.pipeline_mode<synchronous>, transform_indices = @transform_1, window_bounds = array<i64: 128, 128>}, {pipeline_mode = #tpu.pipeline_mode<synchronous>, transform_indices = @transform_2, window_bounds = array<i64: 1, 128>}, {pipeline_mode = #tpu.pipeline_mode<synchronous>, transform_indices = @transform_3, window_bounds = array<i64: 1, 128>}, {pipeline_mode = #tpu.pipeline_mode<synchronous>, transform_indices = @transform_4, window_bounds = array<i64: 1, 128>}, {transform_indices = @transform_5, window_bounds = array<i64: 128, 256>}, {transform_indices = @transform_6, window_bounds = array<i64: 1, 256>}, {transform_indices = @transform_7, window_bounds = array<i64: 16, 256>}]} {
    %c0_i32 = arith.constant 0 : i32
    %0 = arith.cmpi eq, %arg1, %c0_i32 : i32
    %1 = arith.extui %0 : i1 to i32
    %c0_i32_0 = arith.constant 0 : i32
    %2 = arith.cmpi ne, %1, %c0_i32_0 : i32
    scf.if %2 {
      %c0_8 = arith.constant 0 : index
      %c0_9 = arith.constant 0 : index
      %10 = vector.load %arg2[%c0_8, %c0_9] : memref<16x128xf32, #tpu.memory_space<vmem>>, vector<16x128xf32>
      %c0_10 = arith.constant 0 : index
      %c0_11 = arith.constant 0 : index
      %11 = vector.load %arg3[%c0_10, %c0_11] : memref<128x128xf32, #tpu.memory_space<vmem>>, vector<128x128xf32>
      %cst_12 = arith.constant dense<0.000000e+00> : vector<16x128xf32>
      %12 = tpu.matmul %10, %11, %cst_12 {dimension_numbers = #tpu.dot_dimension_numbers<[1], [0], [0], [1], [0, 0, 1, 1], [], []>} : vector<16x128xf32>, vector<128x128xf32>, vector<16x128xf32> -> vector<16x128xf32>
      %c0_13 = arith.constant 0 : index
      %c0_14 = arith.constant 0 : index
      %13 = vector.load %arg4[%c0_13, %c0_14] : memref<1x128xf32, #tpu.memory_space<vmem>>, vector<1x128xf32>
      %14 = vector.broadcast %13 : vector<1x128xf32> to vector<16x128xf32>
      %15 = arith.addf %12, %14 : vector<16x128xf32>
      %cst_15 = arith.constant 5.000000e-01 : f32
      %16 = vector.broadcast %cst_15 : f32 to vector<16x128xf32>
      %17 = arith.mulf %16, %15 : vector<16x128xf32>
      %cst_16 = arith.constant 0.707106769 : f32
      %18 = vector.broadcast %cst_16 : f32 to vector<16x128xf32>
      %19 = arith.mulf %15, %18 : vector<16x128xf32>
      %20 = math.erf %19 : vector<16x128xf32>
      %cst_17 = arith.constant 1.000000e+00 : f32
      %21 = vector.broadcast %cst_17 : f32 to vector<16x128xf32>
      %22 = arith.addf %21, %20 : vector<16x128xf32>
      %23 = arith.mulf %17, %22 : vector<16x128xf32>
      %cst_18 = arith.constant dense<0.000000e+00> : vector<16xf32>
      %24 = vector.multi_reduction <add>, %23, %cst_18 [1] : vector<16x128xf32> to vector<16xf32>
      %25 = vector.shape_cast %24 : vector<16xf32> to vector<16x1xf32>
      %cst_19 = arith.constant 1.280000e+02 : f32
      %26 = vector.broadcast %cst_19 : f32 to vector<16x1xf32>
      %27 = arith.divf %25, %26 : vector<16x1xf32>
      %28 = vector.broadcast %27 : vector<16x1xf32> to vector<16x128xf32>
      %29 = arith.subf %23, %28 : vector<16x128xf32>
      %30 = arith.mulf %29, %29 : vector<16x128xf32>
      %cst_20 = arith.constant dense<0.000000e+00> : vector<16xf32>
      %31 = vector.multi_reduction <add>, %30, %cst_20 [1] : vector<16x128xf32> to vector<16xf32>
      %32 = vector.shape_cast %31 : vector<16xf32> to vector<16x1xf32>
      %cst_21 = arith.constant 1.280000e+02 : f32
      %33 = vector.broadcast %cst_21 : f32 to vector<16x1xf32>
      %34 = arith.divf %32, %33 : vector<16x1xf32>
      %35 = vector.broadcast %27 : vector<16x1xf32> to vector<16x128xf32>
      %36 = arith.subf %23, %35 : vector<16x128xf32>
      %cst_22 = arith.constant 9.99999974E-6 : f32
      %37 = vector.broadcast %cst_22 : f32 to vector<16x1xf32>
      %38 = arith.addf %34, %37 : vector<16x1xf32>
      %39 = math.rsqrt %38 : vector<16x1xf32>
      %40 = vector.broadcast %39 : vector<16x1xf32> to vector<16x128xf32>
      %41 = arith.mulf %36, %40 : vector<16x128xf32>
      %c0_23 = arith.constant 0 : index
      %c0_24 = arith.constant 0 : index
      %42 = vector.load %arg5[%c0_23, %c0_24] : memref<1x128xf32, #tpu.memory_space<vmem>>, vector<1x128xf32>
      %43 = vector.broadcast %42 : vector<1x128xf32> to vector<16x128xf32>
      %44 = arith.mulf %41, %43 : vector<16x128xf32>
      %c0_25 = arith.constant 0 : index
      %c0_26 = arith.constant 0 : index
      %45 = vector.load %arg6[%c0_25, %c0_26] : memref<1x128xf32, #tpu.memory_space<vmem>>, vector<1x128xf32>
      %46 = vector.broadcast %45 : vector<1x128xf32> to vector<16x128xf32>
      %47 = arith.addf %44, %46 : vector<16x128xf32>
      %c0_27 = arith.constant 0 : index
      %c0_28 = arith.constant 0 : index
      %48 = vector.load %arg10[%c0_27, %c0_28] : memref<16x128xf32, #tpu.memory_space<vmem>>, vector<16x128xf32>
      tpu.vector_store %arg10[%c0_27, %c0_28], %47 {strides = array<i32>} : memref<16x128xf32, #tpu.memory_space<vmem>>, vector<16x128xf32>,
    } else {
    }
    %c0 = arith.constant 0 : index
    %c0_1 = arith.constant 0 : index
    %3 = vector.load %arg10[%c0, %c0_1] : memref<16x128xf32, #tpu.memory_space<vmem>>, vector<16x128xf32>
    %c0_2 = arith.constant 0 : index
    %c0_3 = arith.constant 0 : index
    %4 = vector.load %arg7[%c0_2, %c0_3] : memref<128x256xf32, #tpu.memory_space<vmem>>, vector<128x256xf32>
    %cst = arith.constant dense<0.000000e+00> : vector<16x256xf32>
    %5 = tpu.matmul %3, %4, %cst {dimension_numbers = #tpu.dot_dimension_numbers<[1], [0], [0], [1], [0, 0, 1, 1], [], []>} : vector<16x128xf32>, vector<128x256xf32>, vector<16x256xf32> -> vector<16x256xf32>
    %c0_4 = arith.constant 0 : index
    %c0_5 = arith.constant 0 : index
    %6 = vector.load %arg8[%c0_4, %c0_5] : memref<1x256xf32, #tpu.memory_space<vmem>>, vector<1x256xf32>
    %7 = vector.broadcast %6 : vector<1x256xf32> to vector<16x256xf32>
    %8 = arith.addf %5, %7 : vector<16x256xf32>
    %c0_6 = arith.constant 0 : index
    %c0_7 = arith.constant 0 : index
    %9 = vector.load %arg9[%c0_6, %c0_7] : memref<16x256xf32, #tpu.memory_space<vmem>>, vector<16x256xf32>
    tpu.vector_store %arg9[%c0_6, %c0_7], %8 {strides = array<i32>} : memref<16x256xf32, #tpu.memory_space<vmem>>, vector<16x256xf32>,
    return
  }
  func.func @transform_0(%arg0: i32, %arg1: i32) -> (i32, i32) {
    %c0_i32 = arith.constant 0 : i32
    %c0_i32_0 = arith.constant 0 : i32
    return %arg0, %c0_i32 : i32, i32
  }
  func.func @transform_1(%arg0: i32, %arg1: i32) -> (i32, i32) {
    %c0_i32 = arith.constant 0 : i32
    %c0_i32_0 = arith.constant 0 : i32
    %c0_i32_1 = arith.constant 0 : i32
    return %c0_i32, %c0_i32_0 : i32, i32
  }
  func.func @transform_2(%arg0: i32, %arg1: i32) -> (i32, i32) {
    %c0_i32 = arith.constant 0 : i32
    %c0_i32_0 = arith.constant 0 : i32
    %c0_i32_1 = arith.constant 0 : i32
    return %c0_i32, %c0_i32_0 : i32, i32
  }
  func.func @transform_3(%arg0: i32, %arg1: i32) -> (i32, i32) {
    %c0_i32 = arith.constant 0 : i32
    %c0_i32_0 = arith.constant 0 : i32
    %c0_i32_1 = arith.constant 0 : i32
    return %c0_i32, %c0_i32_0 : i32, i32
  }
  func.func @transform_4(%arg0: i32, %arg1: i32) -> (i32, i32) {
    %c0_i32 = arith.constant 0 : i32
    %c0_i32_0 = arith.constant 0 : i32
    %c0_i32_1 = arith.constant 0 : i32
    return %c0_i32, %c0_i32_0 : i32, i32
  }
  func.func @transform_5(%arg0: i32, %arg1: i32) -> (i32, i32) {
    %c0_i32 = arith.constant 0 : i32
    %c0_i32_0 = arith.constant 0 : i32
    return %c0_i32, %arg1 : i32, i32
  }
  func.func @transform_6(%arg0: i32, %arg1: i32) -> (i32, i32) {
    %c0_i32 = arith.constant 0 : i32
    %c0_i32_0 = arith.constant 0 : i32
    return %c0_i32, %arg1 : i32, i32
  }
  func.func @transform_7(%arg0: i32, %arg1: i32) -> (i32, i32) {
    %c0_i32 = arith.constant 0 : i32
    return %arg0, %arg1 : i32, i32
  }
}

</mosaic_0001>

<bundles_post_ra>
// kernel: tpu_custom_call.1
= control target key start
LH: loop header
LB: loop body
LE: loop exit
PB: predicated region body
PF: predicated region fallthrough
CT: control target
= control target key end

     0   :  { %12 = vsyncpa [#allocation4], 0  ;;  %s723_s0 = inlined_call_operand.hbm [shape: f32[16,128], index: 0, kind: input, shape index: {}]   ;;  %s724_s1 = inlined_call_operand.hbm [shape: f32[128,128], index: 1, kind: input, shape index: {}]   ;;  %s725_s2 = inlined_call_operand.vmem [shape: f32[1,128], index: 2, kind: input, shape index: {}]   ;;  %s726_s3 = inlined_call_operand.vmem [shape: f32[1,128], index: 3, kind: input, shape index: {}]   ;;  %s727_s4 = inlined_call_operand.vmem [shape: f32[1,128], index: 4, kind: input, shape index: {}]   ;;  %s728_s5 = inlined_call_operand.hbm [shape: f32[128,256], index: 5, kind: input, shape index: {}]   ;;  %s729_s6 = inlined_call_operand.vmem [shape: f32[1,256], index: 6, kind: input, shape index: {}]   ;;  %s730_s7 = inlined_call_operand.hbm [shape: f32[16,256], index: 7, kind: output, shape index: {}]  }
   0x1   :  { %13 = vsyncpa [#allocation7], 0 }
   0x2   :  { %14 = vsyncpa [#allocation5], 0  ;;  %s601_s24 = smov [#allocation6]   ;;  %s602_s26 = smov [#allocation3]  }
   0x3   :  { %s32_s25 = sshll.u32 %s601_s24, 4  ;;  %s20_s27 = sshll.u32 %s602_s26, 4  ;;  %s33_s25 = int_to_ptr.vmem [resolvable:$true] %s32_s25  ;;  %s650_s27 = int_to_ptr.vmem [resolvable:$true] %s20_s27 }
   0x4   :  { %s507_s30 = scalar_lea.hbm %s724_s1, 2048 }
   0x5   :  { %p508_p0 = scmp.ne.s32.totalorder %s724_s1, %s507_s30  ;;  %p511_p1 = scmp.lt.u32.totalorder %s507_s30, %s724_s1 }
   0x7   :  { %p513_p2 = pnand %p511_p1, %p508_p0 }
   0x9   :  { %516 = shalt.err (!%p513_p2)
}
   0xa   :  { %s517_s12 = scalar_lea.vmem %s33_s25, 2048  ;;  %p522_p4 = scmp.lt.s32.totalorder %s33_s25, %s33_s25 }
   0xb   :  { %p518_p3 = scmp.ne.s32.totalorder %s33_s25, %s517_s12  ;;  %p523_p5 = scmp.lt.s32.totalorder %s517_s12, %s517_s12 }
   0xd   :  { %p524_p6 = por %p523_p5, %p522_p4 }
   0xf   :  { %p525_p7 = pnand %p524_p6, %p518_p3 }
  0x11   :  { %528 = shalt.err (!%p525_p7)
}
  0x12   :  { %s603_s13 = smov 128   ;;  %s604_s14 = smov 8  }
  0x13   :  { %38 = dma.hbm_to_vmem [thread:$0]  %s724_s1, 2048, %s33_s25, [#allocation7], %s603_s13, %s603_s13, %s604_s14  }
  0x14   :  { %s529_s19 = scalar_lea.hbm %s723_s0, 256 }
  0x15   :  { %p530_p8 = scmp.ne.s32.totalorder %s723_s0, %s529_s19  ;;  %p533_p9 = scmp.lt.u32.totalorder %s529_s19, %s723_s0 }
  0x17   :  { %p535_p10 = pnand %p533_p9, %p530_p8 }
  0x19   :  { %538 = shalt.err (!%p535_p10)
}
  0x1a   :  { %s539_s24 = scalar_lea.vmem %s650_s27, 256  ;;  %p544_p12 = scmp.lt.s32.totalorder %s650_s27, %s650_s27 }
  0x1b   :  { %p540_p11 = scmp.ne.s32.totalorder %s650_s27, %s539_s24  ;;  %p545_p13 = scmp.lt.s32.totalorder %s539_s24, %s539_s24 }
  0x1d   :  { %p546_p0 = por %p545_p13, %p544_p12 }
  0x1f   :  { %p547_p1 = pnand %p546_p0, %p540_p11 }
  0x21   :  { %550 = shalt.err (!%p547_p1)
}
  0x22   :  { %26 = dma.hbm_to_vmem [thread:$0]  %s723_s0, 256, %s650_s27, [#allocation4], %s603_s13, %s603_s13, %s604_s14  }
  0x23   :  { %s605_s26 = smov [#allocation8]   ;;  %s551_s8 = scalar_lea.hbm %s728_s5, 4096 }
  0x24   :  { %s50_s28 = sshll.u32 %s605_s26, 4  ;;  %p552_p2 = scmp.ne.s32.totalorder %s728_s5, %s551_s8  ;;  %s51_s28 = int_to_ptr.vmem [resolvable:$true] %s50_s28 }
  0x25   :  { %p555_p3 = scmp.lt.u32.totalorder %s551_s8, %s728_s5 }
  0x27   :  { %p557_p4 = pnand %p555_p3, %p552_p2 }
  0x29   :  { %560 = shalt.err (!%p557_p4)
}
  0x2a   :  { %s561_s15 = scalar_lea.vmem %s51_s28, 4096  ;;  %p566_p6 = scmp.lt.s32.totalorder %s51_s28, %s51_s28 }
  0x2b   :  { %p562_p5 = scmp.ne.s32.totalorder %s51_s28, %s561_s15  ;;  %p567_p7 = scmp.lt.s32.totalorder %s561_s15, %s561_s15 }
  0x2d   :  { %p568_p8 = por %p567_p7, %p566_p6 }
  0x2f   :  { %p569_p9 = pnand %p568_p8, %p562_p5 }
  0x31   :  { %572 = shalt.err (!%p569_p9)
}
  0x32   :  { %s606_s0 = smov 256   ;;  %s607_s27 = smov 16  }
  0x33   :  { %56 = dma.hbm_to_vmem [thread:$0]  %s728_s5, 4096, %s51_s28, [#allocation7], %s606_s0, %s606_s0, %s607_s27  }
  0x34   :  { %595 = dma.done.wait [#allocation4], 256  }
  0x35   :  { %596 = vsyncadd [#allocation4], 4294967040 }
  0x36   :  { %597 = dma.done.wait [#allocation7], 6144  }
  0x37   :  { %598 = vsyncadd [#allocation7], 4294961152  ;;  %v74_v0 = vld [vmem:[#allocation6] sm:$0xff]  ;;  %v75_v1 = vld [vmem:[#allocation6 + $0x8] sm:$0xff] }
  0x38   :  { %v76_v2 = vld [vmem:[#allocation6 + $0x10] sm:$0xff]  ;;  %v426_v3 = vpack.c.bf16 %v75_v1, %v74_v0  ;;  %v77_v4 = vld [vmem:[#allocation6 + $0x18] sm:$0xff]  ;;  %v78_v6 = vld [vmem:[#allocation6 + $0x20] sm:$0xff] }
  0x39   :  { %v430_v5 = vpack.c.bf16 %v77_v4, %v76_v2  ;;  %v79_v7 = vld [vmem:[#allocation6 + $0x28] sm:$0xff]  ;;  %v72_v9 = vld [vmem:[#allocation3] sm:$0xff]  ;;  %v81_v11 = vld [vmem:[#allocation6 + $0x38] sm:$0xff] }
  0x3a   :  { %427 = vmatprep.subr.bf16.mxu0 %v426_v3  ;;  %v434_v8 = vpack.c.bf16 %v79_v7, %v78_v6  ;;  %v80_v10 = vld [vmem:[#allocation6 + $0x30] sm:$0xff]  ;;  %423 = vmatprep.mubr.f32.mxu0 %v72_v9  ;;  %v82_v13 = vld [vmem:[#allocation6 + $0x40] sm:$0xff]  ;;  %v83_v14 = vld [vmem:[#allocation6 + $0x48] sm:$0xff] }
  0x3b   :  { %429 = vmatpush3.bf16.msra.mxu0 %v426_v3  ;;  %v438_v12 = vpack.c.bf16 %v81_v11, %v80_v10  ;;  %v442_v15 = vpack.c.bf16 %v83_v14, %v82_v13  ;;  %v84_v16 = vld [vmem:[#allocation6 + $0x50] sm:$0xff]  ;;  %v85_v17 = vld [vmem:[#allocation6 + $0x58] sm:$0xff]  ;;  %v86_v19 = vld [vmem:[#allocation6 + $0x60] sm:$0xff] }
  0x3c   :  { %431 = vmatprep.subr.bf16.mxu0 %v430_v5  ;;  %v446_v18 = vpack.c.bf16 %v85_v17, %v84_v16  ;;  %v87_v20 = vld [vmem:[#allocation6 + $0x68] sm:$0xff]  ;;  %v88_v22 = vld [vmem:[#allocation6 + $0x70] sm:$0xff]  ;;  %v89_v23 = vld [vmem:[#allocation6 + $0x78] sm:$0xff] }
  0x3d   :  { %v450_v21 = vpack.c.bf16 %v87_v20, %v86_v19  ;;  %v454_v24 = vpack.c.bf16 %v89_v23, %v88_v22  ;;  %v73_v25 = vld [vmem:[#allocation3 + $0x8] sm:$0xff]  ;;  %v370_v26 = vld [vmem:[%s725_s2] ss:$0 sm:$0xff]  ;;  %v228_v41 = vld [vmem:[#allocation8 + $0x8] sm:$0xff] }
  0x3e   :  { %v230_v42 = vld [vmem:[#allocation8 + $0x18] sm:$0xff]  ;;  %v227_v43 = vld [vmem:[#allocation8] sm:$0xff]  ;;  %v229_v45 = vld [vmem:[#allocation8 + $0x10] sm:$0xff] }
  0x3f   :  { %433 = vmatpush3.bf16.msra.mxu0 %v430_v5  ;;  %v458_v44 = vpack.c.bf16 %v230_v42, %v228_v41  ;;  %v232_v46 = vld [vmem:[#allocation8 + $0x28] sm:$0xff]  ;;  %v234_v47 = vld [vmem:[#allocation8 + $0x38] sm:$0xff]  ;;  %v460_v48 = vpack.c.bf16 %v229_v45, %v227_v43  ;;  %v231_v50 = vld [vmem:[#allocation8 + $0x20] sm:$0xff] }
  0x40   :  { %435 = vmatprep.subr.bf16.mxu0 %v434_v8  ;;  %v462_v49 = vpack.c.bf16 %v234_v47, %v232_v46  ;;  %v233_v51 = vld [vmem:[#allocation8 + $0x30] sm:$0xff]  ;;  %v236_v52 = vld [vmem:[#allocation8 + $0x48] sm:$0xff]  ;;  %v238_v53 = vld [vmem:[#allocation8 + $0x58] sm:$0xff] }
  0x41   :  { %459 = vmatprep.subr.bf16.mxu1 %v458_v44  ;;  %v464_v54 = vpack.c.bf16 %v233_v51, %v231_v50  ;;  %v466_v55 = vpack.c.bf16 %v238_v53, %v236_v52  ;;  %v235_v56 = vld [vmem:[#allocation8 + $0x40] sm:$0xff]  ;;  %v237_v57 = vld [vmem:[#allocation8 + $0x50] sm:$0xff]  ;;  %v240_v3 = vld [vmem:[#allocation8 + $0x68] sm:$0xff]  ;;  %v261_v50 = vlaneseq }
  0x42   :  { %461 = vmatpush1.bf16.msra.mxu1 %v460_v48  ;;  %v468_v58 = vpack.c.bf16 %v237_v57, %v235_v56  ;;  %v242_v4 = vld [vmem:[#allocation8 + $0x78] sm:$0xff]  ;;  %v239_v6 = vld [vmem:[#allocation8 + $0x60] sm:$0xff]  ;;  %v241_v7 = vld [vmem:[#allocation8 + $0x70] sm:$0xff] }
  0x43   :  { %437 = vmatpush3.bf16.msra.mxu0 %v434_v8  ;;  %463 = vmatprep.subr.bf16.mxu1 %v462_v49  ;;  %v470_v5 = vpack.c.bf16 %v242_v4, %v240_v3  ;;  %v472_v8 = vpack.c.bf16 %v241_v7, %v239_v6  ;;  %v244_v9 = vld [vmem:[#allocation8 + $0x88] sm:$0xff]  ;;  %v246_v10 = vld [vmem:[#allocation8 + $0x98] sm:$0xff]  ;;  %v245_v13 = vld [vmem:[#allocation8 + $0x90] sm:$0xff]  ;;  %v262_v51 = vshrl.u32 %v261_v50, 7 }
  0x44   :  { %439 = vmatprep.subr.bf16.mxu0 %v438_v12  ;;  %v474_v11 = vpack.c.bf16 %v246_v10, %v244_v9  ;;  %v250_v16 = vld [vmem:[#allocation8 + $0xb8] sm:$0xff]  ;;  %v249_v19 = vld [vmem:[#allocation8 + $0xb0] sm:$0xff]  ;;  %v251_v23 = vld [vmem:[#allocation8 + $0xc0] sm:$0xff] }
  0x45   :  { %v254_v22 = vld [vmem:[#allocation8 + $0xd8] sm:$0xff]  ;;  %v371_v41 = vld [vmem:[%s726_s3] ss:$0 sm:$0xff]  ;;  %v263_v52 = vsub.s32 0, %v262_v51  ;;  %s609_s3 = smov [#allocation9]  }
  0x46   :  { %465 = vmatpush1.bf16.msra.mxu1 %v464_v54  ;;  %v372_v43 = vld [vmem:[%s727_s4] ss:$0 sm:$0xff]  ;;  %v267_v54 = vsub.s32 1, %v262_v51  ;;  %s357_s4 = sshll.u32 %s609_s3, 4  ;;  %s358_s4 = int_to_ptr.vmem [resolvable:$true] %s357_s4 }
  0x47   :  { %441 = vmatpush3.bf16.msra.mxu0 %v438_v12  ;;  %467 = vmatprep.subr.bf16.mxu1 %v466_v55  ;;  %v243_v12 = vld [vmem:[#allocation8 + $0x80] sm:$0xff]  ;;  %v259_v53 = vld [vmem:[%s729_s6] sm:$0x3]  ;;  %s573_s22 = scalar_lea.vmem %s358_s4, 512  ;;  %p578_p11 = scmp.lt.s32.totalorder %s358_s4, %s358_s4 }
  0x48   :  { %443 = vmatprep.subr.bf16.mxu0 %v442_v15  ;;  %v476_v14 = vpack.c.bf16 %v245_v13, %v243_v12  ;;  %v264_v55 = vrot.slane %v259_v53, %v263_v52  ;;  %v268_v56 = vrot.slane %v259_v53, %v267_v54  ;;  %p574_p10 = scmp.ne.s32.totalorder %s358_s4, %s573_s22  ;;  %p579_p12 = scmp.lt.s32.totalorder %s573_s22, %s573_s22 }
  0x4a   :  { %469 = vmatpush1.bf16.msra.mxu1 %v468_v58  ;;  %p580_p13 = por %p579_p12, %p578_p11 }
  0x4b   :  { %445 = vmatpush3.bf16.msra.mxu0 %v442_v15  ;;  %471 = vmatprep.subr.bf16.mxu1 %v470_v5  ;;  %v248_v15 = vld [vmem:[#allocation8 + $0xa8] sm:$0xff] }
  0x4c   :  { %447 = vmatprep.subr.bf16.mxu0 %v446_v18  ;;  %v478_v17 = vpack.c.bf16 %v250_v16, %v248_v15  ;;  %p581_p0 = pnand %p580_p13, %p574_p10 }
  0x4e   :  { %473 = vmatpush1.bf16.msra.mxu1 %v472_v8 }
  0x4f   :  { %449 = vmatpush3.bf16.msra.mxu0 %v446_v18  ;;  %475 = vmatprep.subr.bf16.mxu1 %v474_v11  ;;  %v247_v18 = vld [vmem:[#allocation8 + $0xa0] sm:$0xff] }
  0x50   :  { %451 = vmatprep.subr.bf16.mxu0 %v450_v21  ;;  %v480_v20 = vpack.c.bf16 %v249_v19, %v247_v18 }
  0x52   :  { %477 = vmatpush1.bf16.msra.mxu1 %v476_v14 }
  0x53   :  { %453 = vmatpush3.bf16.msra.mxu0 %v450_v21  ;;  %v252_v21 = vld [vmem:[#allocation8 + $0xc8] sm:$0xff]  ;;  %479 = vmatprep.subr.bf16.mxu1 %v478_v17 }
  0x54   :  { %455 = vmatprep.subr.bf16.mxu0 %v454_v24 }
  0x56   :  { %481 = vmatpush1.bf16.msra.mxu1 %v480_v20 }
  0x57   :  { %457 = vmatpush3.bf16.msra.mxu0 %v454_v24  ;;  %v482_v24 = vpack.c.bf16 %v254_v22, %v252_v21 }
  0x59   :  { %483 = vmatprep.subr.bf16.mxu1 %v482_v24 }
  0x5a   :  { %424 = vmatmul.mubr.f32.vlgmr.msra.gmra.mrb[0].mxu0 %v73_v25  ;;  %v253_v25 = vld [vmem:[#allocation8 + $0xd0] sm:$0xff] }
 0x12d   :  { %v425_v27 = vpop.f32.mrb[0].mxu0 }
 0x12e   :  { %v169_v28 = vadd.f32 %v425_v27, %v370_v26  ;;  %v163_v29 = vpop.f32.mrb[1].mxu0  ;;  %v258_v27 = vld [vmem:[#allocation8 + $0xf8] sm:$0xff] }
 0x12f   :  { %v164_v30 = vadd.f32 %v370_v26, %v163_v29  ;;  %v256_v26 = vld [vmem:[#allocation8 + $0xe8] sm:$0xff]  ;;  %v484_v29 = vpack.c.bf16 %v253_v25, %v251_v23 }
 0x130   :  { %v175_v31 = vmul.f32 0.70710677, %v169_v28  ;;  %v173_v39 = vmul.f32 0.5, %v169_v28  ;;  %v608_v28 = vmov 0.0  }
 0x131   :  { %v174_v32 = vmul.f32 0.70710677, %v164_v30  ;;  %v172_v35 = vmul.f32 0.5, %v164_v30  ;;  %335 = vmatprep.mubr.f32.mxu1 %v608_v28  ;;  %v486_v30 = vpack.c.bf16 %v258_v27, %v256_v26  ;;  %485 = vmatpush1.bf16.msra.mxu1 %v484_v29 }
 0x132   :  { %499 = verf.f32 %v175_v31  ;;  %v255_v31 = vld [vmem:[#allocation8 + $0xe0] sm:$0xff] }
 0x133   :  { %501 = verf.f32 %v174_v32  ;;  %v257_v32 = vld [vmem:[#allocation8 + $0xf0] sm:$0xff]  ;;  %487 = vmatprep.subr.bf16.mxu1 %v486_v30 }
 0x13c   :  { %v500_v33 = vpop.eup %499 }
 0x13d   :  { %v502_v34 = vpop.eup %501  ;;  %v179_v38 = vadd.f32 1.0, %v500_v33  ;;  %v488_v33 = vpack.c.bf16 %v257_v32, %v255_v31 }
 0x13e   :  { %v178_v36 = vadd.f32 1.0, %v502_v34 }
 0x13f   :  { %v181_v40 = vmul.f32 %v179_v38, %v173_v39  ;;  %489 = vmatpush1.bf16.msra.mxu1 %v488_v33 }
 0x140   :  { %v180_v37 = vmul.f32 %v178_v36, %v172_v35 }
 0x142   :  { %182 = vadd.xlane.f32.xlu0 %v180_v37 }
 0x146   :  { %184 = vadd.xlane.f32.xlu0 %v181_v40 }
 0x1cf   :  { %v183_v59 = vpop.xlane.xlu0 %182 }
 0x1d0   :  { %v187_v60 = vmul.f32 0.0078125, %v183_v59 }
 0x1d2   :  { %v189_v61 = vsub.f32 %v180_v37, %v187_v60 }
 0x1d3   :  { %v185_v62 = vpop.xlane.xlu0 %184 }
 0x1d4   :  { %v188_v63 = vmul.f32 0.0078125, %v185_v62  ;;  %v191_v0 = vmul.f32 %v189_v61, %v189_v61 }
 0x1d6   :  { %v190_v1 = vsub.f32 %v181_v40, %v188_v63  ;;  %193 = vadd.xlane.f32.xlu1 %v191_v0 }
 0x1d8   :  { %v192_v2 = vmul.f32 %v190_v1, %v190_v1 }
 0x1da   :  { %195 = vadd.xlane.f32.xlu1 %v192_v2 }
 0x263   :  { %v194_v34 = vpop.xlane.xlu1 %193 }
 0x264   :  { %v197_v35 = vmul.f32 0.0078125, %v194_v34 }
 0x266   :  { %v199_v36 = vadd.f32 1e-05, %v197_v35 }
 0x267   :  { %v196_v37 = vpop.xlane.xlu1 %195 }
 0x268   :  { %503 = vrsqrt.f32 %v199_v36  ;;  %v198_v38 = vmul.f32 0.0078125, %v196_v37 }
 0x26a   :  { %v200_v39 = vadd.f32 1e-05, %v198_v38 }
 0x26c   :  { %505 = vrsqrt.f32 %v200_v39 }
 0x272   :  { %v504_v40 = vpop.eup %503 }
 0x273   :  { %v203_v42 = vmul.f32 %v504_v40, %v189_v61 }
 0x275   :  { %v212_v44 = vmul.f32 %v371_v41, %v203_v42 }
 0x276   :  { %v506_v45 = vpop.eup %505 }
 0x277   :  { %v221_v46 = vadd.f32 %v372_v43, %v212_v44  ;;  %v204_v47 = vmul.f32 %v506_v45, %v190_v1 }
 0x279   :  { %336 = vmatmul.mubr.f32.vlgmr.msra.gmra.mrb[0].mxu1 %v221_v46  ;;  %v213_v48 = vmul.f32 %v371_v41, %v204_v47 }
 0x27a   :  { %341 = vmatprep.mubr.f32.mxu1 %v608_v28 }
 0x27b   :  { %v222_v49 = vadd.f32 %v372_v43, %v213_v48 }
 0x27d   :  { %342 = vmatmul.mubr.f32.gmra.mrb[2].mxu1 %v222_v49 }
 0x34c   :  { %v337_v57 = vpop.f32.mrb[0].mxu1 }
 0x34d   :  { %v338_v58 = vadd.f32 %v337_v57, %v264_v55  ;;  %v339_v59 = vpop.f32.mrb[1].mxu1 }
 0x34e   :  { %v340_v60 = vadd.f32 %v339_v59, %v268_v56 }
 0x34f   :  { %348 = vst [vmem:[#allocation9] sm:$0xff] %v338_v58 }
 0x350   :  { %349 = vst [vmem:[#allocation9 + $0x8] sm:$0xff] %v340_v60  ;;  %v343_v61 = vpop.f32.mrb[2].mxu1 }
 0x351   :  { %v344_v62 = vadd.f32 %v343_v61, %v264_v55  ;;  %v345_v63 = vpop.f32.mrb[3].mxu1 }
 0x352   :  { %v346_v0 = vadd.f32 %v345_v63, %v268_v56 }
 0x353   :  { %350 = vst [vmem:[#allocation9 + $0x10] sm:$0xff] %v344_v62 }
 0x354   :  { %351 = vst [vmem:[#allocation9 + $0x18] sm:$0xff] %v346_v0 }
 0x355   :  { %584 = shalt.err (!%p581_p0)
}
 0x356   :  { %s585_s24 = scalar_lea.hbm %s730_s7, 512 }
 0x357   :  { %p586_p1 = scmp.ne.s32.totalorder %s730_s7, %s585_s24  ;;  %p589_p2 = scmp.lt.u32.totalorder %s585_s24, %s730_s7 }
 0x359   :  { %p591_p3 = pnand %p589_p2, %p586_p1 }
 0x35b   :  { %594 = shalt.err (!%p591_p3)
}
 0x35c   :  { %363 = dma.vmem_to_hbm [thread:$0]  %s358_s4, 512, %s730_s7, [#allocation5], %s606_s0, %s606_s0, %s607_s27  }
 0x35d   :  { %599 = dma.done.wait [#allocation5], 512  }
 0x35e   :  { %600 = vsyncadd [#allocation5], 4294966784 }
 0x35f   :  { %367 = vsyncpa [#allocation4], 1 }
 0x360   :  { %368 = vsyncpa [#allocation7], 1 }
 0x361   :  { %369 = vsyncpa [#allocation5], 1 }

// kernel: tpu_custom_call.1
= control target key start
LH: loop header
LB: loop body
LE: loop exit
PB: predicated region body
PF: predicated region fallthrough
CT: control target
= control target key end

     0   :  { %12 = vsyncpa [#allocation4], 0  ;;  %s723_s0 = inlined_call_operand.hbm [shape: f32[16,128], index: 0, kind: input, shape index: {}]   ;;  %s724_s1 = inlined_call_operand.hbm [shape: f32[128,128], index: 1, kind: input, shape index: {}]   ;;  %s725_s2 = inlined_call_operand.vmem [shape: f32[1,128], index: 2, kind: input, shape index: {}]   ;;  %s726_s3 = inlined_call_operand.vmem [shape: f32[1,128], index: 3, kind: input, shape index: {}]   ;;  %s727_s4 = inlined_call_operand.vmem [shape: f32[1,128], index: 4, kind: input, shape index: {}]   ;;  %s728_s5 = inlined_call_operand.hbm [shape: f32[128,256], index: 5, kind: input, shape index: {}]   ;;  %s729_s6 = inlined_call_operand.vmem [shape: f32[1,256], index: 6, kind: input, shape index: {}]   ;;  %s730_s7 = inlined_call_operand.hbm [shape: f32[16,256], index: 7, kind: output, shape index: {}]  }
   0x1   :  { %13 = vsyncpa [#allocation7], 0 }
   0x2   :  { %14 = vsyncpa [#allocation5], 0  ;;  %s601_s24 = smov [#allocation6]   ;;  %s602_s26 = smov [#allocation3]  }
   0x3   :  { %s32_s25 = sshll.u32 %s601_s24, 4  ;;  %s20_s27 = sshll.u32 %s602_s26, 4  ;;  %s33_s25 = int_to_ptr.vmem [resolvable:$true] %s32_s25  ;;  %s650_s27 = int_to_ptr.vmem [resolvable:$true] %s20_s27 }
   0x4   :  { %s507_s30 = scalar_lea.hbm %s724_s1, 2048 }
   0x5   :  { %p508_p0 = scmp.ne.s32.totalorder %s724_s1, %s507_s30  ;;  %p511_p1 = scmp.lt.u32.totalorder %s507_s30, %s724_s1 }
   0x7   :  { %p513_p2 = pnand %p511_p1, %p508_p0 }
   0x9   :  { %516 = shalt.err (!%p513_p2)
}
   0xa   :  { %s517_s12 = scalar_lea.vmem %s33_s25, 2048  ;;  %p522_p4 = scmp.lt.s32.totalorder %s33_s25, %s33_s25 }
   0xb   :  { %p518_p3 = scmp.ne.s32.totalorder %s33_s25, %s517_s12  ;;  %p523_p5 = scmp.lt.s32.totalorder %s517_s12, %s517_s12 }
   0xd   :  { %p524_p6 = por %p523_p5, %p522_p4 }
   0xf   :  { %p525_p7 = pnand %p524_p6, %p518_p3 }
  0x11   :  { %528 = shalt.err (!%p525_p7)
}
  0x12   :  { %s603_s13 = smov 128   ;;  %s604_s14 = smov 8  }
  0x13   :  { %38 = dma.hbm_to_vmem [thread:$0]  %s724_s1, 2048, %s33_s25, [#allocation7], %s603_s13, %s603_s13, %s604_s14  }
  0x14   :  { %s529_s19 = scalar_lea.hbm %s723_s0, 256 }
  0x15   :  { %p530_p8 = scmp.ne.s32.totalorder %s723_s0, %s529_s19  ;;  %p533_p9 = scmp.lt.u32.totalorder %s529_s19, %s723_s0 }
  0x17   :  { %p535_p10 = pnand %p533_p9, %p530_p8 }
  0x19   :  { %538 = shalt.err (!%p535_p10)
}
  0x1a   :  { %s539_s24 = scalar_lea.vmem %s650_s27, 256  ;;  %p544_p12 = scmp.lt.s32.totalorder %s650_s27, %s650_s27 }
  0x1b   :  { %p540_p11 = scmp.ne.s32.totalorder %s650_s27, %s539_s24  ;;  %p545_p13 = scmp.lt.s32.totalorder %s539_s24, %s539_s24 }
  0x1d   :  { %p546_p0 = por %p545_p13, %p544_p12 }
  0x1f   :  { %p547_p1 = pnand %p546_p0, %p540_p11 }
  0x21   :  { %550 = shalt.err (!%p547_p1)
}
  0x22   :  { %26 = dma.hbm_to_vmem [thread:$0]  %s723_s0, 256, %s650_s27, [#allocation4], %s603_s13, %s603_s13, %s604_s14  }
  0x23   :  { %s605_s26 = smov [#allocation8]   ;;  %s551_s8 = scalar_lea.hbm %s728_s5, 4096 }
  0x24   :  { %s50_s28 = sshll.u32 %s605_s26, 4  ;;  %p552_p2 = scmp.ne.s32.totalorder %s728_s5, %s551_s8  ;;  %s51_s28 = int_to_ptr.vmem [resolvable:$true] %s50_s28 }
  0x25   :  { %p555_p3 = scmp.lt.u32.totalorder %s551_s8, %s728_s5 }
  0x27   :  { %p557_p4 = pnand %p555_p3, %p552_p2 }
  0x29   :  { %560 = shalt.err (!%p557_p4)
}
  0x2a   :  { %s561_s15 = scalar_lea.vmem %s51_s28, 4096  ;;  %p566_p6 = scmp.lt.s32.totalorder %s51_s28, %s51_s28 }
  0x2b   :  { %p562_p5 = scmp.ne.s32.totalorder %s51_s28, %s561_s15  ;;  %p567_p7 = scmp.lt.s32.totalorder %s561_s15, %s561_s15 }
  0x2d   :  { %p568_p8 = por %p567_p7, %p566_p6 }
  0x2f   :  { %p569_p9 = pnand %p568_p8, %p562_p5 }
  0x31   :  { %572 = shalt.err (!%p569_p9)
}
  0x32   :  { %s606_s0 = smov 256   ;;  %s607_s27 = smov 16  }
  0x33   :  { %56 = dma.hbm_to_vmem [thread:$0]  %s728_s5, 4096, %s51_s28, [#allocation7], %s606_s0, %s606_s0, %s607_s27  }
  0x34   :  { %595 = dma.done.wait [#allocation4], 256  }
  0x35   :  { %596 = vsyncadd [#allocation4], 4294967040 }
  0x36   :  { %597 = dma.done.wait [#allocation7], 6144  }
  0x37   :  { %598 = vsyncadd [#allocation7], 4294961152  ;;  %v74_v0 = vld [vmem:[#allocation6] sm:$0xff]  ;;  %v75_v1 = vld [vmem:[#allocation6 + $0x8] sm:$0xff] }
  0x38   :  { %v76_v2 = vld [vmem:[#allocation6 + $0x10] sm:$0xff]  ;;  %v426_v3 = vpack.c.bf16 %v75_v1, %v74_v0  ;;  %v77_v4 = vld [vmem:[#allocation6 + $0x18] sm:$0xff]  ;;  %v78_v6 = vld [vmem:[#allocation6 + $0x20] sm:$0xff] }
  0x39   :  { %v430_v5 = vpack.c.bf16 %v77_v4, %v76_v2  ;;  %v79_v7 = vld [vmem:[#allocation6 + $0x28] sm:$0xff]  ;;  %v72_v9 = vld [vmem:[#allocation3] sm:$0xff]  ;;  %v81_v11 = vld [vmem:[#allocation6 + $0x38] sm:$0xff] }
  0x3a   :  { %427 = vmatprep.subr.bf16.mxu0 %v426_v3  ;;  %v434_v8 = vpack.c.bf16 %v79_v7, %v78_v6  ;;  %v80_v10 = vld [vmem:[#allocation6 + $0x30] sm:$0xff]  ;;  %423 = vmatprep.mubr.f32.mxu0 %v72_v9  ;;  %v82_v13 = vld [vmem:[#allocation6 + $0x40] sm:$0xff]  ;;  %v83_v14 = vld [vmem:[#allocation6 + $0x48] sm:$0xff] }
  0x3b   :  { %429 = vmatpush3.bf16.msra.mxu0 %v426_v3  ;;  %v438_v12 = vpack.c.bf16 %v81_v11, %v80_v10  ;;  %v442_v15 = vpack.c.bf16 %v83_v14, %v82_v13  ;;  %v84_v16 = vld [vmem:[#allocation6 + $0x50] sm:$0xff]  ;;  %v85_v17 = vld [vmem:[#allocation6 + $0x58] sm:$0xff]  ;;  %v86_v19 = vld [vmem:[#allocation6 + $0x60] sm:$0xff] }
  0x3c   :  { %431 = vmatprep.subr.bf16.mxu0 %v430_v5  ;;  %v446_v18 = vpack.c.bf16 %v85_v17, %v84_v16  ;;  %v87_v20 = vld [vmem:[#allocation6 + $0x68] sm:$0xff]  ;;  %v88_v22 = vld [vmem:[#allocation6 + $0x70] sm:$0xff]  ;;  %v89_v23 = vld [vmem:[#allocation6 + $0x78] sm:$0xff] }
  0x3d   :  { %v450_v21 = vpack.c.bf16 %v87_v20, %v86_v19  ;;  %v454_v24 = vpack.c.bf16 %v89_v23, %v88_v22  ;;  %v73_v25 = vld [vmem:[#allocation3 + $0x8] sm:$0xff]  ;;  %v370_v26 = vld [vmem:[%s725_s2] ss:$0 sm:$0xff]  ;;  %v228_v41 = vld [vmem:[#allocation8 + $0x8] sm:$0xff] }
  0x3e   :  { %v230_v42 = vld [vmem:[#allocation8 + $0x18] sm:$0xff]  ;;  %v227_v43 = vld [vmem:[#allocation8] sm:$0xff]  ;;  %v229_v45 = vld [vmem:[#allocation8 + $0x10] sm:$0xff] }
  0x3f   :  { %433 = vmatpush3.bf16.msra.mxu0 %v430_v5  ;;  %v458_v44 = vpack.c.bf16 %v230_v42, %v228_v41  ;;  %v232_v46 = vld [vmem:[#allocation8 + $0x28] sm:$0xff]  ;;  %v234_v47 = vld [vmem:[#allocation8 + $0x38] sm:$0xff]  ;;  %v460_v48 = vpack.c.bf16 %v229_v45, %v227_v43  ;;  %v231_v50 = vld [vmem:[#allocation8 + $0x20] sm:$0xff] }
  0x40   :  { %435 = vmatprep.subr.bf16.mxu0 %v434_v8  ;;  %v462_v49 = vpack.c.bf16 %v234_v47, %v232_v46  ;;  %v233_v51 = vld [vmem:[#allocation8 + $0x30] sm:$0xff]  ;;  %v236_v52 = vld [vmem:[#allocation8 + $0x48] sm:$0xff]  ;;  %v238_v53 = vld [vmem:[#allocation8 + $0x58] sm:$0xff] }
  0x41   :  { %459 = vmatprep.subr.bf16.mxu1 %v458_v44  ;;  %v464_v54 = vpack.c.bf16 %v233_v51, %v231_v50  ;;  %v466_v55 = vpack.c.bf16 %v238_v53, %v236_v52  ;;  %v235_v56 = vld [vmem:[#allocation8 + $0x40] sm:$0xff]  ;;  %v237_v57 = vld [vmem:[#allocation8 + $0x50] sm:$0xff]  ;;  %v240_v3 = vld [vmem:[#allocation8 + $0x68] sm:$0xff]  ;;  %v261_v50 = vlaneseq }
  0x42   :  { %461 = vmatpush1.bf16.msra.mxu1 %v460_v48  ;;  %v468_v58 = vpack.c.bf16 %v237_v57, %v235_v56  ;;  %v242_v4 = vld [vmem:[#allocation8 + $0x78] sm:$0xff]  ;;  %v239_v6 = vld [vmem:[#allocation8 + $0x60] sm:$0xff]  ;;  %v241_v7 = vld [vmem:[#allocation8 + $0x70] sm:$0xff] }
  0x43   :  { %437 = vmatpush3.bf16.msra.mxu0 %v434_v8  ;;  %463 = vmatprep.subr.bf16.mxu1 %v462_v49  ;;  %v470_v5 = vpack.c.bf16 %v242_v4, %v240_v3  ;;  %v472_v8 = vpack.c.bf16 %v241_v7, %v239_v6  ;;  %v244_v9 = vld [vmem:[#allocation8 + $0x88] sm:$0xff]  ;;  %v246_v10 = vld [vmem:[#allocation8 + $0x98] sm:$0xff]  ;;  %v245_v13 = vld [vmem:[#allocation8 + $0x90] sm:$0xff]  ;;  %v262_v51 = vshrl.u32 %v261_v50, 7 }
  0x44   :  { %439 = vmatprep.subr.bf16.mxu0 %v438_v12  ;;  %v474_v11 = vpack.c.bf16 %v246_v10, %v244_v9  ;;  %v250_v16 = vld [vmem:[#allocation8 + $0xb8] sm:$0xff]  ;;  %v249_v19 = vld [vmem:[#allocation8 + $0xb0] sm:$0xff]  ;;  %v251_v23 = vld [vmem:[#allocation8 + $0xc0] sm:$0xff] }
  0x45   :  { %v254_v22 = vld [vmem:[#allocation8 + $0xd8] sm:$0xff]  ;;  %v371_v41 = vld [vmem:[%s726_s3] ss:$0 sm:$0xff]  ;;  %v263_v52 = vsub.s32 0, %v262_v51  ;;  %s609_s3 = smov [#allocation9]  }
  0x46   :  { %465 = vmatpush1.bf16.msra.mxu1 %v464_v54  ;;  %v372_v43 = vld [vmem:[%s727_s4] ss:$0 sm:$0xff]  ;;  %v267_v54 = vsub.s32 1, %v262_v51  ;;  %s357_s4 = sshll.u32 %s609_s3, 4  ;;  %s358_s4 = int_to_ptr.vmem [resolvable:$true] %s357_s4 }
  0x47   :  { %441 = vmatpush3.bf16.msra.mxu0 %v438_v12  ;;  %467 = vmatprep.subr.bf16.mxu1 %v466_v55  ;;  %v243_v12 = vld [vmem:[#allocation8 + $0x80] sm:$0xff]  ;;  %v259_v53 = vld [vmem:[%s729_s6] sm:$0x3]  ;;  %s573_s22 = scalar_lea.vmem %s358_s4, 512  ;;  %p578_p11 = scmp.lt.s32.totalorder %s358_s4, %s358_s4 }
  0x48   :  { %443 = vmatprep.subr.bf16.mxu0 %v442_v15  ;;  %v476_v14 = vpack.c.bf16 %v245_v13, %v243_v12  ;;  %v264_v55 = vrot.slane %v259_v53, %v263_v52  ;;  %v268_v56 = vrot.slane %v259_v53, %v267_v54  ;;  %p574_p10 = scmp.ne.s32.totalorder %s358_s4, %s573_s22  ;;  %p579_p12 = scmp.lt.s32.totalorder %s573_s22, %s573_s22 }
  0x4a   :  { %469 = vmatpush1.bf16.msra.mxu1 %v468_v58  ;;  %p580_p13 = por %p579_p12, %p578_p11 }
  0x4b   :  { %445 = vmatpush3.bf16.msra.mxu0 %v442_v15  ;;  %471 = vmatprep.subr.bf16.mxu1 %v470_v5  ;;  %v248_v15 = vld [vmem:[#allocation8 + $0xa8] sm:$0xff] }
  0x4c   :  { %447 = vmatprep.subr.bf16.mxu0 %v446_v18  ;;  %v478_v17 = vpack.c.bf16 %v250_v16, %v248_v15  ;;  %p581_p0 = pnand %p580_p13, %p574_p10 }
  0x4e   :  { %473 = vmatpush1.bf16.msra.mxu1 %v472_v8 }
  0x4f   :  { %449 = vmatpush3.bf16.msra.mxu0 %v446_v18  ;;  %475 = vmatprep.subr.bf16.mxu1 %v474_v11  ;;  %v247_v18 = vld [vmem:[#allocation8 + $0xa0] sm:$0xff] }
  0x50   :  { %451 = vmatprep.subr.bf16.mxu0 %v450_v21  ;;  %v480_v20 = vpack.c.bf16 %v249_v19, %v247_v18 }
  0x52   :  { %477 = vmatpush1.bf16.msra.mxu1 %v476_v14 }
  0x53   :  { %453 = vmatpush3.bf16.msra.mxu0 %v450_v21  ;;  %v252_v21 = vld [vmem:[#allocation8 + $0xc8] sm:$0xff]  ;;  %479 = vmatprep.subr.bf16.mxu1 %v478_v17 }
  0x54   :  { %455 = vmatprep.subr.bf16.mxu0 %v454_v24 }
  0x56   :  { %481 = vmatpush1.bf16.msra.mxu1 %v480_v20 }
  0x57   :  { %457 = vmatpush3.bf16.msra.mxu0 %v454_v24  ;;  %v482_v24 = vpack.c.bf16 %v254_v22, %v252_v21 }
  0x59   :  { %483 = vmatprep.subr.bf16.mxu1 %v482_v24 }
  0x5a   :  { %424 = vmatmul.mubr.f32.vlgmr.msra.gmra.mrb[0].mxu0 %v73_v25  ;;  %v253_v25 = vld [vmem:[#allocation8 + $0xd0] sm:$0xff] }
 0x12d   :  { %v425_v27 = vpop.f32.mrb[0].mxu0 }
 0x12e   :  { %v169_v28 = vadd.f32 %v425_v27, %v370_v26  ;;  %v163_v29 = vpop.f32.mrb[1].mxu0  ;;  %v258_v27 = vld [vmem:[#allocation8 + $0xf8] sm:$0xff] }
 0x12f   :  { %v164_v30 = vadd.f32 %v370_v26, %v163_v29  ;;  %v256_v26 = vld [vmem:[#allocation8 + $0xe8] sm:$0xff]  ;;  %v484_v29 = vpack.c.bf16 %v253_v25, %v251_v23 }
 0x130   :  { %v175_v31 = vmul.f32 0.70710677, %v169_v28  ;;  %v173_v39 = vmul.f32 0.5, %v169_v28  ;;  %v608_v28 = vmov 0.0  }
 0x131   :  { %v174_v32 = vmul.f32 0.70710677, %v164_v30  ;;  %v172_v35 = vmul.f32 0.5, %v164_v30  ;;  %335 = vmatprep.mubr.f32.mxu1 %v608_v28  ;;  %v486_v30 = vpack.c.bf16 %v258_v27, %v256_v26  ;;  %485 = vmatpush1.bf16.msra.mxu1 %v484_v29 }
 0x132   :  { %499 = verf.f32 %v175_v31  ;;  %v255_v31 = vld [vmem:[#allocation8 + $0xe0] sm:$0xff] }
 0x133   :  { %501 = verf.f32 %v174_v32  ;;  %v257_v32 = vld [vmem:[#allocation8 + $0xf0] sm:$0xff]  ;;  %487 = vmatprep.subr.bf16.mxu1 %v486_v30 }
 0x13c   :  { %v500_v33 = vpop.eup %499 }
 0x13d   :  { %v502_v34 = vpop.eup %501  ;;  %v179_v38 = vadd.f32 1.0, %v500_v33  ;;  %v488_v33 = vpack.c.bf16 %v257_v32, %v255_v31 }
 0x13e   :  { %v178_v36 = vadd.f32 1.0, %v502_v34 }
 0x13f   :  { %v181_v40 = vmul.f32 %v179_v38, %v173_v39  ;;  %489 = vmatpush1.bf16.msra.mxu1 %v488_v33 }
 0x140   :  { %v180_v37 = vmul.f32 %v178_v36, %v172_v35 }
 0x142   :  { %182 = vadd.xlane.f32.xlu0 %v180_v37 }
 0x146   :  { %184 = vadd.xlane.f32.xlu0 %v181_v40 }
 0x1cf   :  { %v183_v59 = vpop.xlane.xlu0 %182 }
 0x1d0   :  { %v187_v60 = vmul.f32 0.0078125, %v183_v59 }
 0x1d2   :  { %v189_v61 = vsub.f32 %v180_v37, %v187_v60 }
 0x1d3   :  { %v185_v62 = vpop.xlane.xlu0 %184 }
 0x1d4   :  { %v188_v63 = vmul.f32 0.0078125, %v185_v62  ;;  %v191_v0 = vmul.f32 %v189_v61, %v189_v61 }
 0x1d6   :  { %v190_v1 = vsub.f32 %v181_v40, %v188_v63  ;;  %193 = vadd.xlane.f32.xlu1 %v191_v0 }
 0x1d8   :  { %v192_v2 = vmul.f32 %v190_v1, %v190_v1 }
 0x1da   :  { %195 = vadd.xlane.f32.xlu1 %v192_v2 }
 0x263   :  { %v194_v34 = vpop.xlane.xlu1 %193 }
 0x264   :  { %v197_v35 = vmul.f32 0.0078125, %v194_v34 }
 0x266   :  { %v199_v36 = vadd.f32 1e-05, %v197_v35 }
 0x267   :  { %v196_v37 = vpop.xlane.xlu1 %195 }
 0x268   :  { %503 = vrsqrt.f32 %v199_v36  ;;  %v198_v38 = vmul.f32 0.0078125, %v196_v37 }
 0x26a   :  { %v200_v39 = vadd.f32 1e-05, %v198_v38 }
 0x26c   :  { %505 = vrsqrt.f32 %v200_v39 }
 0x272   :  { %v504_v40 = vpop.eup %503 }
 0x273   :  { %v203_v42 = vmul.f32 %v504_v40, %v189_v61 }
 0x275   :  { %v212_v44 = vmul.f32 %v371_v41, %v203_v42 }
 0x276   :  { %v506_v45 = vpop.eup %505 }
 0x277   :  { %v221_v46 = vadd.f32 %v372_v43, %v212_v44  ;;  %v204_v47 = vmul.f32 %v506_v45, %v190_v1 }
 0x279   :  { %336 = vmatmul.mubr.f32.vlgmr.msra.gmra.mrb[0].mxu1 %v221_v46  ;;  %v213_v48 = vmul.f32 %v371_v41, %v204_v47 }
 0x27a   :  { %341 = vmatprep.mubr.f32.mxu1 %v608_v28 }
 0x27b   :  { %v222_v49 = vadd.f32 %v372_v43, %v213_v48 }
 0x27d   :  { %342 = vmatmul.mubr.f32.gmra.mrb[2].mxu1 %v222_v49 }
 0x34c   :  { %v337_v57 = vpop.f32.mrb[0].mxu1 }
 0x34d   :  { %v338_v58 = vadd.f32 %v337_v57, %v264_v55  ;;  %v339_v59 = vpop.f32.mrb[1].mxu1 }
 0x34e   :  { %v340_v60 = vadd.f32 %v339_v59, %v268_v56 }
 0x34f   :  { %348 = vst [vmem:[#allocation9] sm:$0xff] %v338_v58 }
 0x350   :  { %349 = vst [vmem:[#allocation9 + $0x8] sm:$0xff] %v340_v60  ;;  %v343_v61 = vpop.f32.mrb[2].mxu1 }
 0x351   :  { %v344_v62 = vadd.f32 %v343_v61, %v264_v55  ;;  %v345_v63 = vpop.f32.mrb[3].mxu1 }
 0x352   :  { %v346_v0 = vadd.f32 %v345_v63, %v268_v56 }
 0x353   :  { %350 = vst [vmem:[#allocation9 + $0x10] sm:$0xff] %v344_v62 }
 0x354   :  { %351 = vst [vmem:[#allocation9 + $0x18] sm:$0xff] %v346_v0 }
 0x355   :  { %584 = shalt.err (!%p581_p0)
}
 0x356   :  { %s585_s24 = scalar_lea.hbm %s730_s7, 512 }
 0x357   :  { %p586_p1 = scmp.ne.s32.totalorder %s730_s7, %s585_s24  ;;  %p589_p2 = scmp.lt.u32.totalorder %s585_s24, %s730_s7 }
 0x359   :  { %p591_p3 = pnand %p589_p2, %p586_p1 }
 0x35b   :  { %594 = shalt.err (!%p591_p3)
}
 0x35c   :  { %363 = dma.vmem_to_hbm [thread:$0]  %s358_s4, 512, %s730_s7, [#allocation5], %s606_s0, %s606_s0, %s607_s27  }
 0x35d   :  { %599 = dma.done.wait [#allocation5], 512  }
 0x35e   :  { %600 = vsyncadd [#allocation5], 4294966784 }
 0x35f   :  { %367 = vsyncpa [#allocation4], 1 }
 0x360   :  { %368 = vsyncpa [#allocation7], 1 }
 0x361   :  { %369 = vsyncpa [#allocation5], 1 }

</bundles_post_ra>
